<compile_context>
chip_gen: v6e
topology: v6e:2x2x1
jax: 0.10.0
libtpu: 0.0.40
codegen_flags: <defaults>
</compile_context>

<pallas_src>
import math

import jax
import jax.numpy as jnp
from jax import lax
from jax.experimental import pallas as pl
from jax.experimental.pallas import tpu as pltpu


def _build_pe_table(max_len: int, d_model: int) -> jnp.ndarray:
    """Deterministic sinusoidal PE table, shape (max_len, 1, d_model), f32."""
    position = jnp.arange(0, max_len, dtype=jnp.float32)[:, None]          # (L, 1)
    div_term = jnp.exp(
        jnp.arange(0, d_model, 2, dtype=jnp.float32) * (-math.log(10000.0) / d_model)
    )                                                                       # (D/2,)
    angles = position * div_term                                            # (L, D/2)
    pe = jnp.zeros((max_len, d_model), dtype=jnp.float32)
    pe = pe.at[:, 0::2].set(jnp.sin(angles))
    pe = pe.at[:, 1::2].set(jnp.cos(angles))
    return pe[:, None, :]                                                   # (L, 1, D)


# ----------------------------------------------------------------------------- kernels
def _pe_add_rows_kernel(x_ref, pe_ref, o_ref):
    """Fast path.  x_ref/o_ref: (ts, B*D) row-major slab; pe_ref: (ts, D) f32.

    The single PE tile is added to each D-wide batch column.  Slices are
    static and lane-aligned (D % 128 == 0 whenever B > 1), so every store is
    an unmasked full-width vst.
    """
    d = pe_ref.shape[-1]
    nb = x_ref.shape[-1] // d
    pe = pe_ref[...]                                   # stays f32; add promotes
    if nb <= 32:
        for k in range(nb):                            # static unroll
            sl = slice(k * d, (k + 1) * d)
            o_ref[:, sl] = (x_ref[:, sl] + pe).astype(o_ref.dtype)
    else:
        def body(k, carry):
            off = pl.multiple_of(k * d, 128)           # d % 128 == 0 on this path
            o_ref[:, pl.ds(off, d)] = (x_ref[:, pl.ds(off, d)] + pe).astype(o_ref.dtype)
            return carry
        lax.fori_loop(0, nb, body, 0)


def _pe_add_bcast_kernel(x_ref, pe_ref, o_ref):
    """Fallback.  x_ref/o_ref: (ts, B, D); pe_ref: (ts, 1, D) -> batch broadcast."""
    o_ref[...] = (x_ref[...] + pe_ref[...]).astype(o_ref.dtype)


# ----------------------------------------------------------------------------- tiling
_TARGET_BUFFER_BYTES = 4 * 1024 * 1024     # per double-buffered x / out buffer


def _vmem_limit_and_budget():
    """Generation-aware scoped-VMEM limit (requested via vmem_limit_bytes) and
    the working-set budget we size tiles against."""
    try:
        cap = int(pltpu.get_tpu_info().vmem_capacity_bytes)
    except Exception:
        cap = 64 * 1024 * 1024             # conservative: v7x per-core physical
    limit = min(cap // 2, 32 * 1024 * 1024)   # <= half physical, <= 32 MiB
    budget = (limit * 3) // 4                 # headroom for Mosaic internals
    return limit, budget


def _choose_seq_tile(S: int, row_bytes: int, pe_row_bytes: int, budget: int) -> int:
    """Largest seq tile that (a) keeps the double-buffered working set
    (2x x-in + 2x out + 2x pe) under `budget`, (b) targets ~4 MiB per x/out
    buffer, (c) is a multiple of 8 (or equals S), and (d) leaves >= 2 seq
    blocks when S >= 16 so both v7x TensorCores get work."""
    denom = 4 * max(row_bytes, 1) + 2 * max(pe_row_bytes, 1)
    ts_budget = max(8, budget // denom)
    ts_target = max(8, _TARGET_BUFFER_BYTES // max(row_bytes, 1))
    ts = min(ts_budget, ts_target, S)
    if ts >= S:
        ts = S                                  # full dim is always a legal block
    else:
        ts = max(8, (ts // 8) * 8)              # sublane-aligned tile
    if pl.cdiv(S, ts) < 2 and S >= 16:
        half = pl.cdiv(S, 2)
        ts = max(8, ((half + 7) // 8) * 8)      # split -> 2 blocks (last may be partial)
    return ts


# ----------------------------------------------------------------------------- wrapper
def positional_encoding(x: jnp.ndarray, pe: jnp.ndarray, *,
                        dropout_p: float = 0.0, seq_tile=None) -> jnp.ndarray:
    """x: (S, B, D) seq-first; pe: (max_len, 1, D) f32 buffer.  Returns x + pe[:S].

    The module in the script is built with the global `dropout = 0`, so the
    forward pass is exactly the broadcast add (dropout is the identity).
    """
    assert dropout_p == 0.0, "TODO(synk): p>0 dropout needs pltpu.prng_* in-kernel"
    S, B, D = x.shape
    L = pe.shape[0]
    assert S <= L, "sequence longer than the PE table"

    itemsize = jnp.dtype(x.dtype).itemsize
    pe_itemsize = jnp.dtype(pe.dtype).itemsize
    limit, budget = _vmem_limit_and_budget()
    cparams = pltpu.CompilerParams(
        dimension_semantics=("parallel",),
        vmem_limit_bytes=limit,
    )

    lane_dense = (D % 128 == 0) or (B == 1)
    if lane_dense:
        # ---- Fast path -------------------------------------------------------
        # Free row-major views: x -> (S, B*D), pe -> (L, D).  Each block spans
        # all batch columns (full contiguous rows); the PE tile is (ts, D) and
        # its block index only ever points inside the first S (< L) rows.
        x2 = x.reshape(S, B * D)
        pe2 = pe.reshape(L, D)
        ts = seq_tile if seq_tile is not None else _choose_seq_tile(
            S, B * D * itemsize, D * pe_itemsize, budget)
        grid = (pl.cdiv(S, ts),)
        out2 = pl.pallas_call(
            _pe_add_rows_kernel,
            out_shape=jax.ShapeDtypeStruct((S, B * D), x.dtype),
            grid_spec=pltpu.PrefetchScalarGridSpec(
                num_scalar_prefetch=0,
                grid=grid,
                in_specs=[
                    pl.BlockSpec((ts, B * D), lambda i: (i, 0)),   # full-row x slab
                    pl.BlockSpec((ts, D), lambda i: (i, 0)),       # shared PE tile (f32)
                ],
                out_specs=pl.BlockSpec((ts, B * D), lambda i: (i, 0)),
            ),
            compiler_params=cparams,
        )(x2, pe2)
        return out2.reshape(S, B, D)

    # ---- Fallback path (D not a multiple of 128 and B > 1) --------------------
    # Full (B, D) slab per block with in-kernel batch broadcast.  Correct for
    # any shape; only used for toy widths where perf is irrelevant.
    ts = seq_tile if seq_tile is not None else _choose_seq_tile(
        S, B * D * itemsize, D * pe_itemsize, budget)
    grid = (pl.cdiv(S, ts),)
    return pl.pallas_call(
        _pe_add_bcast_kernel,
        out_shape=jax.ShapeDtypeStruct((S, B, D), x.dtype),
        grid_spec=pltpu.PrefetchScalarGridSpec(
            num_scalar_prefetch=0,
            grid=grid,
            in_specs=[
                pl.BlockSpec((ts, B, D), lambda i: (i, 0, 0)),
                pl.BlockSpec((ts, 1, D), lambda i: (i, 0, 0)),     # PE stays f32
            ],
            out_specs=pl.BlockSpec((ts, B, D), lambda i: (i, 0, 0)),
        ),
        compiler_params=cparams,
    )(x, pe)


# ----------------------------------------------------------------------------- demo
if __name__ == "__main__":
    max_len = 64
    batch = 2
    key = jax.random.PRNGKey(0)

    # 1) Lane-dense width (d_model multiple of 128) -> fast path, full-row blocks.
    d_model = 128
    seq_len = 40
    pe_table = _build_pe_table(max_len, d_model)              # (64, 1, 128) f32
    x = jax.random.normal(key, (seq_len, batch, d_model), dtype=jnp.float32)
    out = jax.block_until_ready(positional_encoding(x, pe_table))
    ref = x + pe_table[:seq_len]
    assert out.shape == x.shape
    assert jnp.allclose(out, ref, atol=1e-6), "fast-path mismatch"

    # 2) Forced small seq tile -> multi-block grid with a partial last tile.
    out_t = jax.block_until_ready(positional_encoding(x, pe_table, seq_tile=16))
    assert jnp.allclose(out_t, ref, atol=1e-6), "tiled fast-path mismatch"

    # 3) bf16 activations (halves HBM traffic); PE stays f32, add promotes,
    #    single rounding at the store.
    x_bf = x.astype(jnp.bfloat16)
    out_bf = jax.block_until_ready(positional_encoding(x_bf, pe_table))
    ref_bf = (x_bf + pe_table[:seq_len]).astype(jnp.bfloat16)
    assert out_bf.dtype == jnp.bfloat16
    assert jnp.allclose(out_bf.astype(jnp.float32), ref_bf.astype(jnp.float32),
                        atol=1e-2), "bf16 mismatch"

    # 4) Toy width (d_model=32, not lane-aligned, batch>1) -> fallback path.
    d_model2, seq_len2 = 32, 8
    pe_small = _build_pe_table(max_len, d_model2)
    x_small = jax.random.normal(jax.random.PRNGKey(0),
                                (seq_len2, batch, d_model2), dtype=jnp.float32)
    out_small = jax.block_until_ready(positional_encoding(x_small, pe_small))
    ref_small = x_small + pe_small[:seq_len2]
    assert jnp.allclose(out_small, ref_small, atol=1e-6), "fallback mismatch"

    print("KERNEL_OK")
</pallas_src>

<mosaic_0001>
module attributes {stable_mosaic.version = 11 : i64} {
  func.func @_pe_add_rows_kernel(%arg0: i32, %arg1: memref<24x256xf32, #tpu.memory_space<vmem>>, %arg2: memref<24x128xf32, #tpu.memory_space<vmem>>, %arg3: memref<24x256xf32, #tpu.memory_space<vmem>>) attributes {dimension_semantics = [#tpu.dimension_semantics<parallel>], iteration_bounds = array<i64: 2>, scalar_prefetch = 0 : i64, scratch_operands = 0 : i64, tpu.core_type = #tpu.core_type<tc>, window_params = [{transform_indices = @transform_0, window_bounds = array<i64: 24, 256>}, {transform_indices = @transform_1, window_bounds = array<i64: 24, 128>}, {transform_indices = @transform_2, window_bounds = array<i64: 24, 256>}]} {
    %c0 = arith.constant 0 : index
    %c0_0 = arith.constant 0 : index
    %0 = vector.load %arg2[%c0, %c0_0] : memref<24x128xf32, #tpu.memory_space<vmem>>, vector<24x128xf32>
    %c0_1 = arith.constant 0 : index
    %c0_2 = arith.constant 0 : index
    %1 = vector.load %arg1[%c0_1, %c0_2] : memref<24x256xf32, #tpu.memory_space<vmem>>, vector<24x128xf32>
    %2 = arith.addf %1, %0 : vector<24x128xf32>
    %c0_3 = arith.constant 0 : index
    %c0_4 = arith.constant 0 : index
    %3 = vector.load %arg3[%c0_3, %c0_4] : memref<24x256xf32, #tpu.memory_space<vmem>>, vector<24x128xf32>
    tpu.vector_store %arg3[%c0_3, %c0_4], %2 {strides = array<i32>} : memref<24x256xf32, #tpu.memory_space<vmem>>, vector<24x128xf32>,
    %c0_5 = arith.constant 0 : index
    %c128 = arith.constant 128 : index
    %4 = vector.load %arg1[%c0_5, %c128] : memref<24x256xf32, #tpu.memory_space<vmem>>, vector<24x128xf32>
    %5 = arith.addf %4, %0 : vector<24x128xf32>
    %c0_6 = arith.constant 0 : index
    %c128_7 = arith.constant 128 : index
    %6 = vector.load %arg3[%c0_6, %c128_7] : memref<24x256xf32, #tpu.memory_space<vmem>>, vector<24x128xf32>
    tpu.vector_store %arg3[%c0_6, %c128_7], %5 {strides = array<i32>} : memref<24x256xf32, #tpu.memory_space<vmem>>, vector<24x128xf32>,
    return
  }
  func.func @transform_0(%arg0: i32) -> (i32, i32) {
    %c0_i32 = arith.constant 0 : i32
    %c0_i32_0 = arith.constant 0 : i32
    return %arg0, %c0_i32 : i32, i32
  }
  func.func @transform_1(%arg0: i32) -> (i32, i32) {
    %c0_i32 = arith.constant 0 : i32
    %c0_i32_0 = arith.constant 0 : i32
    return %arg0, %c0_i32 : i32, i32
  }
  func.func @transform_2(%arg0: i32) -> (i32, i32) {
    %c0_i32 = arith.constant 0 : i32
    %c0_i32_0 = arith.constant 0 : i32
    return %arg0, %c0_i32 : i32, i32
  }
}

</mosaic_0001>

<bundles_post_ra>
// kernel: tpu_custom_call.1
= control target key start
LH: loop header
LB: loop body
LE: loop exit
PB: predicated region body
PF: predicated region fallthrough
CT: control target
= control target key end

     0   :  { %7 = vsyncpa [#allocation3], 0  ;;  %s825_s0 = inlined_call_operand.hbm [shape: f32[40,256], index: 0, kind: input, shape index: {}]   ;;  %s826_s1 = inlined_call_operand.hbm [shape: f32[64,128], index: 1, kind: input, shape index: {}]   ;;  %s827_s2 = inlined_call_operand.hbm [shape: f32[40,256], index: 2, kind: output, shape index: {}]  }
   0x1   :  { %9 = vsyncpa [#allocation3 + $0x1], 0 }
   0x2   :  { %10 = vsyncpa [#allocation6], 0 }
   0x3   :  { %12 = vsyncpa [#allocation6 + $0x1], 0 }
   0x4   :  { %13 = vsyncpa [#allocation4], 0 }
   0x5   :  { %15 = vsyncpa [#allocation4 + $0x1], 0  ;;  %s602_s9 = smov 0   ;;  %s604_s10 = smov 0  }
   0x6   :  { %s606_s11 = smov 0   ;;  %s608_s12 = smov 0  }
   0x7 LB: > { %s623_s13 = sadd.s32 4294967295, %s576_s12   ;;  %s372_s14 = sadd.s32 4294967294, %s576_s12   ;;  %s576_s12 = sphi %s608_s12, %s839_s12   ;;  %s572_s11 = sphi %s606_s11, %s838_s11   ;;  %s568_s10 = sphi %s604_s10, %s837_s10   ;;  %s564_s9 = sphi %s602_s9, %s836_s9  }
   0x8   : > { %s627_s15 = sadd.s32 1, %s576_s12   ;;  %s28_s16 = sadd.s32 1, %s572_s11 }
   0x9   : > { %s25_s17 = ssub.s32 %s576_s12, %s627_s15  ;;  %p35_p0 = scmp.ne.s32.totalorder %s572_s11, %s568_s10 }
   0xa   : > { %p26_p1 = scmp.eq.s32.totalorder %s25_s17, 0  ;;  %p36_p2 = scmp.eq.s32.totalorder %s576_s12, 0 }
   0xb   : > { %p41_p3 = scmp.ne.s32.totalorder %s568_s10, %s564_s9  ;;  %p42_p4 = scmp.eq.s32.totalorder %s623_s13, 0 }
   0xc   : > { %s639_s18 = scalar_select %p26_p1, %s572_s11, %s28_s16  }
   0xd   : > { %p641_p5 = por %p36_p2, %p35_p0  ;;  %p645_p6 = por %p42_p4, %p41_p3 }
   0xe   : > { %p91_p7 = scmp.eq.s32.totalorder %s623_s13, 1  ;;  %p97_p8 = scmp.eq.s32.totalorder %s372_s14, 1 }
   0xf   : > { %p828_p11 = scmp.ge.s32.totalorder %s576_s12, 2 }
  0x10   : > { %p650_p9 = por %p91_p7, %p35_p0  ;;  %p654_p10 = por %p97_p8, %p41_p3 }
  0x11   : > { %113 = sbr.rel (%p828_p11) target bundleno = 90 (0x5a), region = 16 }
  0x12   : > { %s831_s21 = scalar_select %p650_p9, 1, 0 }
  0x13   : > { %s832_s22 = scalar_select %p654_p10, 1, 0 }
  0x16   : > { %116 = sbr.rel (!%p641_p5) target bundleno = 56 (0x38), region = 20  ;;  %s117_s23 = sand.u32 (%p641_p5), 1, %s572_s11  }
  0x17   : > { %s122_s24 = smul.u32 (%p641_p5), 3, %s576_s12  ;;  %s668_s29 = scalar_lea.sflag (%p641_p5), [#allocation3], %s117_s23 }
  0x18   : > { %s406_s25 = smul.u32 (%p641_p5), 48, %s117_s23 }
  0x19   : > { %s123_s26 = ssub.s32 (%p641_p5), 5, %s122_s24 }
  0x1a   : > { %p124_p12 = scmp.lt.s32.totalorder (%p641_p5), %s123_s26, 3  ;;  %s121_s30 = scalar_lea.vmem (%p641_p5), [#allocation2], %s406_s25 }
  0x1c   : > { %s841_s26 = smov (!%p124_p12, %s123_s26), 3 }
  0x1d   : > { %s665_s27 = sshll.u32 %s841_s26, 8 }
  0x1e   : > { %s129_s28 = ssub.s32 768, %s665_s27 }
  0x1f   : > { %130 = vsyncadd %s668_s29, %s129_s28  ;;  %p377_p13 = scmp.ne.s32.totalorder %s665_s27, 0  ;;  %s404_s3 = smul.u32 768, %s576_s12 }
  0x20   : > { %s136_s4 = sshll.u32 %s121_s30, 4  ;;  %s460_s17 = scalar_lea.hbm %s825_s0, 1280  ;;  %s678_s4 = int_to_ptr.vmem [resolvable:$true] %s136_s4 }
  0x21   : > { %s676_s7 = scalar_lea.hbm %s825_s0, %s404_s3 }
  0x22   : > { %s456_s8 = scalar_lea.hbm %s676_s7, %s665_s27  ;;  %p461_p3 = scmp.lt.s32.totalorder %s676_s7, %s825_s0 }
  0x23   : > { %p457_p0 = scmp.ne.s32.totalorder %s676_s7, %s456_s8  ;;  %p462_p4 = scmp.lt.s32.totalorder %s460_s17, %s456_s8 }
  0x25   : > { %p458_p1 = pnand %p457_p0, %p377_p13  ;;  %p463_p7 = por %p462_p4, %p461_p3 }
  0x27   : > { %p459_p2 = pneg %p458_p1 }
  0x29   : > { %p464_p8 = pnand %p463_p7, %p459_p2 }
  0x2b   : > { %467 = shalt.err (!%p464_p8)
}
  0x2c   : > { %s468_s25 = scalar_lea.vmem %s678_s4, %s665_s27  ;;  %s578_s26 = smov [#allocation2]  }
  0x2d   : > { %p469_p12 = scmp.ne.s32.totalorder %s678_s4, %s468_s25  ;;  %s472_s28 = sshll.u32 %s578_s26, 4  ;;  %s473_s28 = int_to_ptr.vmem [resolvable:$false] %s472_s28 }
  0x2e   : > { %s474_s30 = scalar_lea.vmem %s473_s28, 1536  ;;  %p475_p11 = scmp.lt.s32.totalorder %s678_s4, %s473_s28 }
  0x2f   : > { %p470_p0 = pnand %p469_p12, %p377_p13  ;;  %p476_p10 = scmp.lt.s32.totalorder %s474_s30, %s468_s25 }
  0x31   : > { %p471_p1 = pneg %p470_p0  ;;  %p477_p9 = por %p476_p10, %p475_p11 }
  0x33   : > { %p478_p3 = pnand %p477_p9, %p471_p1 }
  0x35   : > { %481 = shalt.err (!%p478_p3)
}
  0x36   : > { %s579_s3 = smov 256   ;;  %s580_s5 = smov 16  }
  0x37   : > { %142 = dma.hbm_to_vmem [thread:$0]  (%p377_p13), %s676_s7, %s665_s27, %s678_s4, %s668_s29, %s579_s3, %s579_s3, %s580_s5  }
  0x38 PF: > { %145 = sbr.rel (!%p641_p5) target bundleno = 90 (0x5a), region = 24  ;;  %s146_s6 = sand.u32 (%p641_p5), 1, %s572_s11  }
  0x39   : > { %s151_s8 = smul.u32 (%p641_p5), 3, %s576_s12  ;;  %s711_s24 = scalar_lea.sflag (%p641_p5), [#allocation6], %s146_s6 }
  0x3a   : > { %s407_s14 = smul.u32 (%p641_p5), 24, %s146_s6 }
  0x3b   : > { %s152_s16 = ssub.s32 (%p641_p5), 8, %s151_s8 }
  0x3c   : > { %p153_p9 = scmp.lt.s32.totalorder (%p641_p5), %s152_s16, 3  ;;  %s150_s27 = scalar_lea.vmem (%p641_p5), [#allocation5], %s407_s14 }
  0x3e   : > { %s843_s16 = smov (!%p153_p9, %s152_s16), 3 }
  0x3f   : > { %s708_s17 = sshll.u32 %s843_s16, 7 }
  0x40   : > { %s157_s23 = ssub.s32 384, %s708_s17 }
  0x41   : > { %158 = vsyncadd %s711_s24, %s157_s23  ;;  %p383_p5 = scmp.ne.s32.totalorder %s708_s17, 0  ;;  %s400_s19 = smul.u32 384, %s576_s12 }
  0x42   : > { %s163_s29 = sshll.u32 %s150_s27, 4  ;;  %s486_s3 = scalar_lea.hbm %s826_s1, 1024  ;;  %s721_s29 = int_to_ptr.vmem [resolvable:$true] %s163_s29 }
  0x43   : > { %s719_s25 = scalar_lea.hbm %s826_s1, %s400_s19 }
  0x44   : > { %s482_s26 = scalar_lea.hbm %s719_s25, %s708_s17  ;;  %p487_p2 = scmp.lt.s32.totalorder %s719_s25, %s826_s1 }
  0x45   : > { %p483_p10 = scmp.ne.s32.totalorder %s719_s25, %s482_s26  ;;  %p488_p4 = scmp.lt.s32.totalorder %s486_s3, %s482_s26 }
  0x47   : > { %p484_p11 = pnand %p483_p10, %p383_p5  ;;  %p489_p7 = por %p488_p4, %p487_p2 }
  0x49   : > { %p485_p13 = pneg %p484_p11 }
  0x4b   : > { %p490_p8 = pnand %p489_p7, %p485_p13 }
  0x4d   : > { %493 = shalt.err (!%p490_p8)
}
  0x4e   : > { %s494_s8 = scalar_lea.vmem %s721_s29, %s708_s17  ;;  %s581_s14 = smov [#allocation5]  }
  0x4f   : > { %p495_p12 = scmp.ne.s32.totalorder %s721_s29, %s494_s8  ;;  %s498_s16 = sshll.u32 %s581_s14, 4  ;;  %s499_s16 = int_to_ptr.vmem [resolvable:$false] %s498_s16 }
  0x50   : > { %s500_s23 = scalar_lea.vmem %s499_s16, 768  ;;  %p501_p3 = scmp.lt.s32.totalorder %s721_s29, %s499_s16 }
  0x51   : > { %p496_p0 = pnand %p495_p12, %p383_p5  ;;  %p502_p9 = scmp.lt.s32.totalorder %s500_s23, %s494_s8 }
  0x53   : > { %p497_p1 = pneg %p496_p0  ;;  %p503_p10 = por %p502_p9, %p501_p3 }
  0x55   : > { %p504_p11 = pnand %p503_p10, %p497_p1 }
  0x57   : > { %507 = shalt.err (!%p504_p11)
}
  0x58   : > { %s582_s27 = smov 128   ;;  %s583_s19 = smov 8  }
  0x59   : > { %169 = dma.hbm_to_vmem [thread:$0]  (%p383_p5), %s719_s25, %s708_s17, %s721_s29, %s711_s24, %s582_s27, %s582_s27, %s583_s19  }
  0x5a PF: > { %p387_p13 = scmp.ge.s32.totalorder %s576_s12, 1  ;;  %p171_p2 = scmp.lt.s32.totalorder %s576_s12, 3 }
  0x5c   : > { %p172_p4 = pnand %p387_p13, %p171_p2 }
  0x5d   : > { %s750_s4 = sand.u32 (!%p172_p4), 1, %s568_s10  }
  0x5e   : > { %175 = sbr.rel (%p172_p4) target bundleno = 139 (0x8b), region = 28  ;;  %s178_s26 = scalar_lea.sflag (!%p172_p4), [#allocation3], %s750_s4 }
  0x5f   : > { %s408_s7 = smul.u32 (!%p172_p4), 48, %s750_s4 }
  0x61   : > { %s181_s28 = scalar_lea.vmem (!%p172_p4), [#allocation2], %s408_s7 }
  0x63   : > { %551 = dma.done.wait (%p645_p6), %s178_s26, 768  }
  0x64   : > { %553 = vsyncadd (%p645_p6), %s178_s26, 4294966528  ;;  %s409_s17 = smul.u32 24, %s750_s4  ;;  %s187_s24 = scalar_lea.sflag [#allocation6], %s750_s4 }
  0x66   : > { %s190_s29 = scalar_lea.vmem [#allocation5], %s409_s17 }
  0x67   : > { %555 = dma.done.wait (%p645_p6), %s187_s24, 384  }
  0x68   : > { %557 = vsyncadd (%p645_p6), %s187_s24, 4294966912  ;;  %v233_v0 = vld [vmem:[%s190_s29] sm:$0xff]  ;;  %v234_v2 = vld [vmem:[%s190_s29 + $0x8] sm:$0xff]  ;;  %s215_s25 = scalar_lea.vmem [#allocation7], %s408_s7  ;;  %s255_s20 = scalar_lea.sflag [#allocation4], %s750_s4 }
  0x69   : > { %v236_v1 = vld [vmem:[%s181_s28] sm:$0xff]  ;;  %v237_v4 = vld [vmem:[%s181_s28 + $0x10] sm:$0xff]  ;;  %v245_v9 = vld [vmem:[%s181_s28 + $0x8] sm:$0xff]  ;;  %p833_p6 = scmp.ne.s32.totalorder %s831_s21, 0 }
  0x6a   : > { %v239_v3 = vadd.f32 %v236_v1, %v233_v0  ;;  %v235_v5 = vld [vmem:[%s190_s29 + $0x10] sm:$0xff]  ;;  %v238_v6 = vld [vmem:[%s181_s28 + $0x20] sm:$0xff]  ;;  %v240_v7 = vadd.f32 %v237_v4, %v234_v2  ;;  %v247_v11 = vld [vmem:[%s181_s28 + $0x28] sm:$0xff]  ;;  %v248_v12 = vadd.f32 %v245_v9, %v233_v0  ;;  %s262_s30 = smul.u32 (%p833_p6), 3, %s623_s13 }
  0x6b   : > { %v241_v8 = vadd.f32 %v238_v6, %v235_v5  ;;  %v246_v10 = vld [vmem:[%s181_s28 + $0x18] sm:$0xff]  ;;  %v250_v14 = vadd.f32 %v247_v11, %v235_v5  ;;  %261 = sbr.rel (!%p833_p6) target bundleno = 139 (0x8b), region = 40 }
  0x6c   : > { %242 = vst [vmem:[%s215_s25] sm:$0xff] %v239_v3  ;;  %v249_v13 = vadd.f32 %v246_v10, %v234_v2  ;;  %243 = vst [vmem:[%s215_s25 + $0x10] sm:$0xff] %v240_v7  ;;  %s263_s3 = ssub.s32 (%p833_p6), 5, %s262_s30 }
  0x6d   : > { %244 = vst [vmem:[%s215_s25 + $0x20] sm:$0xff] %v241_v8  ;;  %251 = vst [vmem:[%s215_s25 + $0x8] sm:$0xff] %v248_v12  ;;  %p264_p5 = scmp.lt.s32.totalorder (%p833_p6), %s263_s3, 3 }
  0x6e   : > { %252 = vst [vmem:[%s215_s25 + $0x18] sm:$0xff] %v249_v13  ;;  %253 = vst [vmem:[%s215_s25 + $0x28] sm:$0xff] %v250_v14 }
  0x70   : > { %s845_s3 = smov (!%p264_p5, %s263_s3), 3 }
  0x71   : > { %s768_s5 = sshll.u32 %s845_s3, 8 }
  0x72   : > { %s269_s6 = ssub.s32 768, %s768_s5 }
  0x73   : > { %270 = vsyncadd %s255_s20, %s269_s6  ;;  %p390_p7 = scmp.ne.s32.totalorder %s768_s5, 0  ;;  %s405_s8 = smul.u32 768, %s623_s13 }
  0x74   : > { %s276_s21 = sshll.u32 %s215_s25, 4  ;;  %s584_s19 = smov [#allocation7]   ;;  %s780_s21 = int_to_ptr.vmem [resolvable:$true] %s276_s21 }
  0x75   : > { %s778_s23 = scalar_lea.hbm %s827_s2, %s405_s8  ;;  %s508_s27 = scalar_lea.vmem %s780_s21, %s768_s5 }
  0x76   : > { %p509_p8 = scmp.ne.s32.totalorder %s780_s21, %s508_s27  ;;  %s512_s7 = sshll.u32 %s584_s19, 4  ;;  %s513_s7 = int_to_ptr.vmem [resolvable:$false] %s512_s7 }
  0x77   : > { %s514_s13 = scalar_lea.vmem %s513_s7, 1536  ;;  %p515_p1 = scmp.lt.s32.totalorder %s780_s21, %s513_s7 }
  0x78   : > { %p510_p12 = pnand %p509_p8, %p390_p7  ;;  %p516_p3 = scmp.lt.s32.totalorder %s514_s13, %s508_s27 }
  0x7a   : > { %p511_p0 = pneg %p510_p12  ;;  %p517_p9 = por %p516_p3, %p515_p1 }
  0x7c   : > { %p518_p10 = pnand %p517_p9, %p511_p0 }
  0x7e   : > { %521 = shalt.err (!%p518_p10)
}
  0x7f   : > { %s522_s26 = scalar_lea.hbm %s778_s23, %s768_s5  ;;  %s526_s24 = scalar_lea.hbm %s827_s2, 1280 }
  0x80   : > { %p523_p11 = scmp.ne.s32.totalorder %s778_s23, %s522_s26  ;;  %p527_p4 = scmp.lt.s32.totalorder %s778_s23, %s827_s2 }
  0x81   : > { %p528_p6 = scmp.lt.s32.totalorder %s526_s24, %s522_s26 }
  0x82   : > { %p524_p13 = pnand %p523_p11, %p390_p7 }
  0x83   : > { %p529_p5 = por %p528_p6, %p527_p4 }
  0x84   : > { %p525_p2 = pneg %p524_p13 }
  0x86   : > { %p530_p8 = pnand %p529_p5, %p525_p2 }
  0x88   : > { %533 = shalt.err (!%p530_p8)
}
  0x89   : > { %s585_s30 = smov 256   ;;  %s586_s3 = smov 16  }
  0x8a   : > { %282 = dma.vmem_to_hbm [thread:$0]  (%p390_p7), %s780_s21, %s768_s5, %s778_s23, %s255_s20, %s585_s30, %s585_s30, %s586_s3  }
  0x8b PF: > { %s291_s6 = sand.u32 1, %s564_s9   ;;  %p834_p12 = scmp.ne.s32.totalorder %s832_s22, 0 }
  0x8c   : > { %p835_p0 = scmp.ge.s32.totalorder %s576_s12, 2  ;;  %s292_s8 = scalar_lea.sflag [#allocation4], %s291_s6 }
  0x8e   : > { %p414_p1 = pnand %p835_p0, %p834_p12 }
  0x90   : > { %p415_p3 = pneg %p414_p1 }
  0x92   : > { %559 = dma.done.wait (%p415_p3), %s292_s8, 768  }
  0x93   : > { %561 = vsyncadd (%p415_p3), %s292_s8, 4294966528  ;;  %p18_p9 = scmp.ge.s32.totalorder %s627_s15, 4   ;;  %s836_s9 = smov %s568_s10 }
  0x94   : > { %s837_s10 = smov %s572_s11  ;;  %s838_s11 = smov %s639_s18 }
  0x95   : > { %s839_s12 = smov %s627_s15  ;;  %20 = sbr.rel (!%p18_p9) target bundleno = 7 (0x7), region = 86 }
  0x9a   :  { %297 = vsyncpa [#allocation3], 1 }
  0x9b   :  { %299 = vsyncpa [#allocation3 + $0x1], 1 }
  0x9c   :  { %300 = vsyncpa [#allocation6], 1 }
  0x9d   :  { %302 = vsyncpa [#allocation6 + $0x1], 1 }
  0x9e   :  { %303 = vsyncpa [#allocation4], 1 }
  0x9f   :  { %305 = vsyncpa [#allocation4 + $0x1], 1 }

</bundles_post_ra>
